<compile_context>
chip_gen: v7x
topology: tpu7x:2x2x1
jax: 0.10.0
libtpu: 0.0.40
codegen_flags: <defaults>
</compile_context>

<pallas_src>
import functools
import math

import jax
import jax.numpy as jnp
from jax import lax
from jax.experimental import pallas as pl
from jax.experimental.pallas import tpu as pltpu


def _graph_attn_kernel(ctx_ref, h_ref, bias_ref, ws_ref, wt_at_ref,
                       out_ref, scr_ref, *, alpha, f_out):
    """One grid step processes R = block_b * N node rows (block_b graphs).

    ctx_ref   : (R, Ds)    source-node features (batch collapsed)
    h_ref     : (R, Dt)    target-node features (batch collapsed)
    bias_ref  : (R, R)     additive mask: 0 attend / -9e15 masked / -3e38 cross-graph
    ws_ref    : (Ds, Fp)   [Ws | Ws@a_s | zero pad]   (Fp multiple of 128)
    wt_at_ref : (1, Dt)    (Wt @ a_t)^T
    out_ref   : (R, Fp)    float32 (padded; cols >= f_out+ are sliced off outside)
    scr_ref   : (R, Fp)    f32 scratch: Ws_ctx columns + the es logit column
    """
    # Fused projection: one MXU pass gives Ws_ctx (cols [0:F)) and the a_s
    # logit column (col F).  f32 accumulation into VMEM scratch.
    scr_ref[...] = jnp.dot(ctx_ref[...], ws_ref[...],
                           preferred_element_type=jnp.float32)

    # Target-side logit term for every row of the block, produced lane-major
    # directly by the MXU (replaces the whole Wt_h projection of v2).
    et = lax.dot_general(wt_at_ref[...], h_ref[...],
                         dimension_numbers=(((1,), (1,)), ((), ())),
                         preferred_element_type=jnp.float32)        # (1, R)

    es = scr_ref[:, f_out:f_out + 1]                                # (R, 1)

    # e[r, c] = leakyrelu(a_s . Ws_ctx[r] + a_t . Wt_h[c]); the additive bias
    # then applies the adjacency mask AND zeroes cross-graph pairs.
    e = es + et                                                     # (R, R)
    e = jnp.where(e > 0, e, alpha * e)                              # LeakyReLU(alpha)
    e = e + bias_ref[...]

    # Numerically stable softmax over the last (lane) axis, all f32.
    m = jnp.max(e, axis=-1, keepdims=True)
    p = jnp.exp(e - m)
    s = jnp.sum(p, axis=-1, keepdims=True)
    inv = pl.reciprocal(s, approx=True)                             # EUP slot
    inv = inv * (2.0 - s * inv)                                     # one Newton step
    attn = p * inv
    # TODO(synk): F.dropout(attention, ...) is a no-op in eval mode
    # (training=False), so it is intentionally omitted here.

    # Single aggregation matmul for the whole block.  Cross-graph attn entries
    # are exactly 0, so the block-diagonal structure is preserved; the es /
    # zero-pad columns of scr produce garbage/zero output columns that are
    # sliced away in the wrapper.
    h_prime = jnp.dot(attn, scr_ref[...],
                      preferred_element_type=jnp.float32)           # (R, Fp)
    h_prime = jnp.where(h_prime > 0, h_prime, 0.01 * h_prime)       # F.leaky_relu
    out_ref[...] = h_prime.astype(out_ref.dtype)                    # lane-dense store


def _pick_block_b(batch, n, *, target_rows=256):
    """Largest divisor of `batch` with block_b * n <= target_rows, keeping the
    collapsed (block_b*n, ...) blocks sublane-tile legal (rows % 8 == 0 or the
    full array).  target_rows ~128-512: per-step work is O(R^2) in the logit /
    bias matrices, so 1-4 lane-chunks per softmax row is the sweet spot; going
    bigger trades quadratic bias HBM traffic for fewer ~0.35us grid steps."""
    cap = max(1, min(batch, target_rows // max(n, 1)))
    for d in range(cap, 0, -1):
        if batch % d:
            continue
        if d == batch or (d * n) % 8 == 0:
            return d
    return batch


def _build_block_bias(adj, block_b, *, neg_masked=-9000000000000000.0,
                      neg_cross=-3e38):
    """Block-diagonal additive attention bias for a block of block_b graphs.

    bias[g*R + b*N + i, b2*N + j] = 0        if b == b2 and adj[...] > 0
                                    -9e15    if b == b2 and adj[...] <= 0
                                    -3e38    if b != b2  (cross-graph)
    The -3e38 cross-graph value is strictly more negative than the in-graph
    masked value so a fully-masked adjacency row still softmaxes to uniform
    over its OWN graph, exactly matching the PyTorch module."""
    B, Nt, Ns = adj.shape
    grid_b = B // block_b
    R = block_b * Ns
    within = jnp.where(adj > 0, jnp.float32(0.0), jnp.float32(neg_masked))
    within = within.reshape(grid_b, block_b, Nt, Ns)
    same = jnp.eye(block_b, dtype=jnp.bool_)
    big = jnp.where(same[None, :, None, :, None],
                    within[:, :, :, None, :],
                    jnp.float32(neg_cross))          # (grid_b, bb, Nt, bb, Ns)
    return big.reshape(grid_b * block_b * Nt, R).astype(jnp.float32)


def graph_encoder_decoder_attention(h, ctx, adj, Ws, Wt, a, *, alpha=0.2,
                                    block_b=None, matmul_dtype=jnp.float32):
    B, Nt, Dt = h.shape
    Bc, Ns, Ds = ctx.shape
    assert B == Bc
    F_out = Ws.shape[1]
    # The PyTorch module's repeat/view trick only reshapes consistently when
    # Ns == Nt (which the final matmul also requires); keep that contract.
    assert Ns == Nt, "module semantics assume Ns == Nt"
    N = Nt

    if block_b is None:
        block_b = _pick_block_b(B, N)
    assert B % block_b == 0
    grid_b = B // block_b
    R = block_b * N
    # Note: on v7x keep grid_b >= 2 when possible so both TensorCores get work.

    # Padded feature width: room for the fused es column, rounded to 128 lanes
    # so both the scratch and the output writeback are lane-dense.
    Fp = ((F_out + 1 + 127) // 128) * 128

    # --- Weight prep (f32), then cast to the matmul streaming dtype. ---------
    a_s = a[:F_out, 0].astype(jnp.float32)
    a_t = a[F_out:, 0].astype(jnp.float32)
    ws_f32 = Ws.astype(jnp.float32)
    wt_f32 = Wt.astype(jnp.float32)
    ws_as = ws_f32 @ a_s                                  # (Ds,)  source logit vector
    wt_at = (wt_f32 @ a_t).reshape(1, Dt)                 # (1,Dt) target logit vector

    ws_aug = jnp.zeros((Ds, Fp), jnp.float32)
    ws_aug = ws_aug.at[:, :F_out].set(ws_f32)
    ws_aug = ws_aug.at[:, F_out].set(ws_as)

    ctx2d = ctx.reshape(B * N, Ds).astype(matmul_dtype)   # free row-major reshape
    h2d = h.reshape(B * N, Dt).astype(matmul_dtype)
    ws_aug = ws_aug.astype(matmul_dtype)
    wt_at = wt_at.astype(matmul_dtype)

    # Adjacency as an additive bias (one VPU add in-kernel, no int8 unpack).
    bias2d = _build_block_bias(adj, block_b)              # (B*N, R) f32

    kernel = functools.partial(_graph_attn_kernel, alpha=alpha, f_out=F_out)
    out2d = pl.pallas_call(
        kernel,
        out_shape=jax.ShapeDtypeStruct((B * N, Fp), jnp.float32),
        grid_spec=pltpu.PrefetchScalarGridSpec(
            num_scalar_prefetch=0,
            grid=(grid_b,),
            in_specs=[
                pl.BlockSpec((R, Ds), lambda i: (i, 0)),
                pl.BlockSpec((R, Dt), lambda i: (i, 0)),
                pl.BlockSpec((R, R), lambda i: (i, 0)),
                pl.BlockSpec((Ds, Fp), lambda i: (0, 0)),
                pl.BlockSpec((1, Dt), lambda i: (0, 0)),
            ],
            out_specs=pl.BlockSpec((R, Fp), lambda i: (i, 0)),
            scratch_shapes=[pltpu.VMEM((R, Fp), jnp.float32)],
        ),
        compiler_params=pltpu.CompilerParams(
            dimension_semantics=("parallel",)),
    )(ctx2d, h2d, bias2d, ws_aug, wt_at)

    # Slice off the padded / es columns and restore (B, N, F) outside the kernel.
    return out2d[:, :F_out].reshape(B, N, F_out)


def _reference(h, ctx, adj, Ws, Wt, a, alpha):
    """Pure-JAX transcription of the PyTorch forward (eval mode)."""
    Ws_ctx = jnp.einsum("bni,io->bno", ctx, Ws)
    Wt_h = jnp.einsum("bni,io->bno", h, Wt)
    B, Ns, F = Ws_ctx.shape
    Nt = Wt_h.shape[1]
    rep_chunks = jnp.repeat(Ws_ctx, Nt, axis=1)           # repeat_interleave(dim=1)
    rep_alt = jnp.tile(Wt_h, (1, Ns, 1))                  # repeat([1, Ns, 1])
    a_input = jnp.concatenate([rep_chunks, rep_alt], axis=2).reshape(B, Nt, Ns, 2 * F)
    e = jnp.squeeze(a_input @ a, axis=3)
    e = jnp.where(e > 0, e, alpha * e)
    att = jnp.where(adj > 0, e, -9000000000000000.0)
    att = jax.nn.softmax(att, axis=2)
    hp = att @ Ws_ctx
    return jnp.where(hp > 0, hp, 0.01 * hp)


def _xavier_uniform(key, shape, gain=1.414):
    fan_in, fan_out = shape
    bound = gain * math.sqrt(6.0 / (fan_in + fan_out))
    return jax.random.uniform(key, shape, jnp.float32, -bound, bound)


if __name__ == "__main__":
    B, N, Ds, Dt, F_out = 2, 8, 16, 24, 32
    alpha = 0.2

    key = jax.random.PRNGKey(0)
    k1, k2, k3, k4, k5, k6 = jax.random.split(key, 6)
    Ws = _xavier_uniform(k1, (Ds, F_out))
    Wt = _xavier_uniform(k2, (Dt, F_out))
    a = _xavier_uniform(k3, (2 * F_out, 1))

    h = jax.random.normal(k4, (B, N, Dt), jnp.float32)
    ctx = jax.random.normal(k5, (B, N, Ds), jnp.float32)
    adj = (jax.random.uniform(k6, (B, N, N)) > 0.3).astype(jnp.float32)

    out = graph_encoder_decoder_attention(h, ctx, adj, Ws, Wt, a, alpha=alpha)
    out = jax.block_until_ready(out)

    ref = _reference(h, ctx, adj, Ws, Wt, a, alpha)
    assert out.shape == (B, N, F_out)
    if not jnp.allclose(out, ref, atol=2e-3, rtol=2e-3):
        raise AssertionError("Pallas kernel does not match reference")
    print("KERNEL_OK")
</pallas_src>

<mosaic_0001>
module attributes {stable_mosaic.version = 11 : i64} {
  func.func @_graph_attn_kernel(%arg0: i32, %arg1: memref<16x16xf32, #tpu.memory_space<vmem>>, %arg2: memref<16x24xf32, #tpu.memory_space<vmem>>, %arg3: memref<16x16xf32, #tpu.memory_space<vmem>>, %arg4: memref<16x128xf32, #tpu.memory_space<vmem>>, %arg5: memref<1x24xf32, #tpu.memory_space<vmem>>, %arg6: memref<16x128xf32, #tpu.memory_space<vmem>>, %arg7: memref<16x128xf32, #tpu.memory_space<vmem>>) attributes {dimension_semantics = [#tpu.dimension_semantics<parallel>], iteration_bounds = array<i64: 1>, scalar_prefetch = 0 : i64, scratch_operands = 1 : i64, tpu.core_type = #tpu.core_type<tc>, window_params = [{transform_indices = @transform_0, window_bounds = array<i64: 16, 16>}, {transform_indices = @transform_1, window_bounds = array<i64: 16, 24>}, {transform_indices = @transform_2, window_bounds = array<i64: 16, 16>}, {pipeline_mode = #tpu.pipeline_mode<synchronous>, transform_indices = @transform_3, window_bounds = array<i64: 16, 128>}, {pipeline_mode = #tpu.pipeline_mode<synchronous>, transform_indices = @transform_4, window_bounds = array<i64: 1, 24>}, {transform_indices = @transform_5, window_bounds = array<i64: 16, 128>}]} {
    %c0 = arith.constant 0 : index
    %c0_0 = arith.constant 0 : index
    %0 = vector.load %arg1[%c0, %c0_0] : memref<16x16xf32, #tpu.memory_space<vmem>>, vector<16x16xf32>
    %c0_1 = arith.constant 0 : index
    %c0_2 = arith.constant 0 : index
    %1 = vector.load %arg4[%c0_1, %c0_2] : memref<16x128xf32, #tpu.memory_space<vmem>>, vector<16x128xf32>
    %cst = arith.constant dense<0.000000e+00> : vector<16x128xf32>
    %2 = tpu.matmul %0, %1, %cst {dimension_numbers = #tpu.dot_dimension_numbers<[1], [0], [0], [1], [0, 0, 1, 1], [], []>} : vector<16x16xf32>, vector<16x128xf32>, vector<16x128xf32> -> vector<16x128xf32>
    %c0_3 = arith.constant 0 : index
    %c0_4 = arith.constant 0 : index
    %3 = vector.load %arg7[%c0_3, %c0_4] : memref<16x128xf32, #tpu.memory_space<vmem>>, vector<16x128xf32>
    tpu.vector_store %arg7[%c0_3, %c0_4], %2 {strides = array<i32>} : memref<16x128xf32, #tpu.memory_space<vmem>>, vector<16x128xf32>,
    %c0_5 = arith.constant 0 : index
    %c0_6 = arith.constant 0 : index
    %4 = vector.load %arg5[%c0_5, %c0_6] : memref<1x24xf32, #tpu.memory_space<vmem>>, vector<1x24xf32>
    %c0_7 = arith.constant 0 : index
    %c0_8 = arith.constant 0 : index
    %5 = vector.load %arg2[%c0_7, %c0_8] : memref<16x24xf32, #tpu.memory_space<vmem>>, vector<16x24xf32>
    %cst_9 = arith.constant dense<0.000000e+00> : vector<1x16xf32>
    %6 = tpu.matmul %4, %5, %cst_9 {dimension_numbers = #tpu.dot_dimension_numbers<[1], [1], [0], [0], [0, 0, 1, 0], [], []>} : vector<1x24xf32>, vector<16x24xf32>, vector<1x16xf32> -> vector<1x16xf32>
    %c0_10 = arith.constant 0 : index
    %c32 = arith.constant 32 : index
    %7 = vector.load %arg7[%c0_10, %c32] : memref<16x128xf32, #tpu.memory_space<vmem>>, vector<16x1xf32>
    %8 = vector.broadcast %7 : vector<16x1xf32> to vector<16x16xf32>
    %9 = vector.broadcast %6 : vector<1x16xf32> to vector<16x16xf32>
    %10 = arith.addf %8, %9 : vector<16x16xf32>
    %cst_11 = arith.constant 0.000000e+00 : f32
    %11 = vector.broadcast %cst_11 : f32 to vector<16x16xf32>
    %12 = arith.cmpf ogt, %10, %11 : vector<16x16xf32>
    %cst_12 = arith.constant 2.000000e-01 : f32
    %13 = vector.broadcast %cst_12 : f32 to vector<16x16xf32>
    %14 = arith.mulf %13, %10 : vector<16x16xf32>
    %15 = arith.select %12, %10, %14 : vector<16x16xi1>, vector<16x16xf32>
    %c0_13 = arith.constant 0 : index
    %c0_14 = arith.constant 0 : index
    %16 = vector.load %arg3[%c0_13, %c0_14] : memref<16x16xf32, #tpu.memory_space<vmem>>, vector<16x16xf32>
    %17 = arith.addf %15, %16 : vector<16x16xf32>
    %cst_15 = arith.constant dense<0xFF800000> : vector<16xf32>
    %18 = vector.multi_reduction <maximumf>, %17, %cst_15 [1] : vector<16x16xf32> to vector<16xf32>
    %19 = vector.shape_cast %18 : vector<16xf32> to vector<16x1xf32>
    %20 = vector.broadcast %19 : vector<16x1xf32> to vector<16x16xf32>
    %21 = arith.subf %17, %20 : vector<16x16xf32>
    %22 = math.exp %21 : vector<16x16xf32>
    %cst_16 = arith.constant dense<0.000000e+00> : vector<16xf32>
    %23 = vector.multi_reduction <add>, %22, %cst_16 [1] : vector<16x16xf32> to vector<16xf32>
    %24 = vector.shape_cast %23 : vector<16xf32> to vector<16x1xf32>
    %25 = tpu.reciprocal %24 {approx = true} : vector<16x1xf32> -> vector<16x1xf32>
    %26 = arith.mulf %24, %25 : vector<16x1xf32>
    %cst_17 = arith.constant 2.000000e+00 : f32
    %27 = vector.broadcast %cst_17 : f32 to vector<16x1xf32>
    %28 = arith.subf %27, %26 : vector<16x1xf32>
    %29 = arith.mulf %25, %28 : vector<16x1xf32>
    %30 = vector.broadcast %29 : vector<16x1xf32> to vector<16x16xf32>
    %31 = arith.mulf %22, %30 : vector<16x16xf32>
    %c0_18 = arith.constant 0 : index
    %c0_19 = arith.constant 0 : index
    %32 = vector.load %arg7[%c0_18, %c0_19] : memref<16x128xf32, #tpu.memory_space<vmem>>, vector<16x128xf32>
    %cst_20 = arith.constant dense<0.000000e+00> : vector<16x128xf32>
    %33 = tpu.matmul %31, %32, %cst_20 {dimension_numbers = #tpu.dot_dimension_numbers<[1], [0], [0], [1], [0, 0, 1, 1], [], []>} : vector<16x16xf32>, vector<16x128xf32>, vector<16x128xf32> -> vector<16x128xf32>
    %cst_21 = arith.constant 0.000000e+00 : f32
    %34 = vector.broadcast %cst_21 : f32 to vector<16x128xf32>
    %35 = arith.cmpf ogt, %33, %34 : vector<16x128xf32>
    %cst_22 = arith.constant 0.00999999977 : f32
    %36 = vector.broadcast %cst_22 : f32 to vector<16x128xf32>
    %37 = arith.mulf %36, %33 : vector<16x128xf32>
    %38 = arith.select %35, %33, %37 : vector<16x128xi1>, vector<16x128xf32>
    %c0_23 = arith.constant 0 : index
    %c0_24 = arith.constant 0 : index
    %39 = vector.load %arg6[%c0_23, %c0_24] : memref<16x128xf32, #tpu.memory_space<vmem>>, vector<16x128xf32>
    tpu.vector_store %arg6[%c0_23, %c0_24], %38 {strides = array<i32>} : memref<16x128xf32, #tpu.memory_space<vmem>>, vector<16x128xf32>,
    return
  }
  func.func @transform_0(%arg0: i32) -> (i32, i32) {
    %c0_i32 = arith.constant 0 : i32
    %c0_i32_0 = arith.constant 0 : i32
    return %arg0, %c0_i32 : i32, i32
  }
  func.func @transform_1(%arg0: i32) -> (i32, i32) {
    %c0_i32 = arith.constant 0 : i32
    %c0_i32_0 = arith.constant 0 : i32
    return %arg0, %c0_i32 : i32, i32
  }
  func.func @transform_2(%arg0: i32) -> (i32, i32) {
    %c0_i32 = arith.constant 0 : i32
    %c0_i32_0 = arith.constant 0 : i32
    return %arg0, %c0_i32 : i32, i32
  }
  func.func @transform_3(%arg0: i32) -> (i32, i32) {
    %c0_i32 = arith.constant 0 : i32
    %c0_i32_0 = arith.constant 0 : i32
    %c0_i32_1 = arith.constant 0 : i32
    return %c0_i32, %c0_i32_0 : i32, i32
  }
  func.func @transform_4(%arg0: i32) -> (i32, i32) {
    %c0_i32 = arith.constant 0 : i32
    %c0_i32_0 = arith.constant 0 : i32
    %c0_i32_1 = arith.constant 0 : i32
    return %c0_i32, %c0_i32_0 : i32, i32
  }
  func.func @transform_5(%arg0: i32) -> (i32, i32) {
    %c0_i32 = arith.constant 0 : i32
    %c0_i32_0 = arith.constant 0 : i32
    return %arg0, %c0_i32 : i32, i32
  }
}

</mosaic_0001>

<bundles_post_ra>
// kernel: tpu_custom_call.1
= control target key start
LH: loop header
LB: loop body
LE: loop exit
PB: predicated region body
PF: predicated region fallthrough
CT: control target
= control target key end

     0   :  { %10 = vsyncpa [#allocation4], 0  ;;  %s744_s0 = inlined_call_operand.hbm [shape: f32[16,16], index: 0, kind: input, shape index: {}]   ;;  %s745_s1 = inlined_call_operand.hbm [shape: f32[16,24], index: 1, kind: input, shape index: {}]   ;;  %s746_s2 = inlined_call_operand.hbm [shape: f32[16,16], index: 2, kind: input, shape index: {}]   ;;  %s747_s3 = inlined_call_operand.hbm [shape: f32[16,128], index: 3, kind: input, shape index: {}]   ;;  %s748_s4 = inlined_call_operand.vmem [shape: f32[1,24], index: 4, kind: input, shape index: {}]   ;;  %s749_s5 = inlined_call_operand.hbm [shape: f32[16,128], index: 5, kind: output, shape index: {}]  }
   0x1   :  { %11 = vsyncpa [#allocation7], 0 }
   0x2   :  { %12 = vsyncpa [#allocation10], 0 }
   0x3   :  { %13 = vsyncpa [#allocation5], 0  ;;  %s600_s18 = smov [#allocation6]   ;;  %s601_s20 = smov [#allocation3]  }
   0x4   :  { %s31_s19 = sshll.u32 %s600_s18, 4  ;;  %s19_s21 = sshll.u32 %s601_s20, 4  ;;  %s32_s19 = int_to_ptr.vmem [resolvable:$true] %s31_s19  ;;  %s641_s21 = int_to_ptr.vmem [resolvable:$true] %s19_s21 }
   0x5   :  { %s482_s24 = scalar_lea.hbm %s745_s1, 256 }
   0x6   :  { %p483_p0 = scmp.ne.s32.totalorder %s745_s1, %s482_s24  ;;  %p486_p1 = scmp.lt.u32.totalorder %s482_s24, %s745_s1 }
   0x8   :  { %p488_p2 = pnand %p486_p1, %p483_p0 }
   0xa   :  { %491 = shalt.err (!%p488_p2)
}
   0xb   :  { %s492_s29 = scalar_lea.vmem %s32_s19, 256  ;;  %p497_p4 = scmp.lt.s32.totalorder %s32_s19, %s32_s19 }
   0xc   :  { %p493_p3 = scmp.ne.s32.totalorder %s32_s19, %s492_s29  ;;  %p498_p5 = scmp.lt.s32.totalorder %s492_s29, %s492_s29 }
   0xe   :  { %p499_p6 = por %p498_p5, %p497_p4 }
  0x10   :  { %p500_p7 = pnand %p499_p6, %p493_p3 }
  0x12   :  { %503 = shalt.err (!%p500_p7)
}
  0x13   :  { %s602_s30 = smov 128   ;;  %s603_s6 = smov 8  }
  0x14   :  { %37 = dma.hbm_to_vmem [thread:$0]  %s745_s1, 256, %s32_s19, [#allocation7], %s602_s30, %s602_s30, %s603_s6  }
  0x15   :  { %s504_s11 = scalar_lea.hbm %s744_s0, 256 }
  0x16   :  { %p505_p8 = scmp.ne.s32.totalorder %s744_s0, %s504_s11  ;;  %p508_p9 = scmp.lt.u32.totalorder %s504_s11, %s744_s0 }
  0x18   :  { %p510_p10 = pnand %p508_p9, %p505_p8 }
  0x1a   :  { %513 = shalt.err (!%p510_p10)
}
  0x1b   :  { %s514_s16 = scalar_lea.vmem %s641_s21, 256  ;;  %p519_p12 = scmp.lt.s32.totalorder %s641_s21, %s641_s21 }
  0x1c   :  { %p515_p11 = scmp.ne.s32.totalorder %s641_s21, %s514_s16  ;;  %p520_p13 = scmp.lt.s32.totalorder %s514_s16, %s514_s16 }
  0x1e   :  { %p521_p0 = por %p520_p13, %p519_p12 }
  0x20   :  { %p522_p1 = pnand %p521_p0, %p515_p11 }
  0x22   :  { %525 = shalt.err (!%p522_p1)
}
  0x23   :  { %25 = dma.hbm_to_vmem [thread:$0]  %s744_s0, 256, %s641_s21, [#allocation4], %s602_s30, %s602_s30, %s603_s6  }
  0x24   :  { %s604_s18 = smov [#allocation8]   ;;  %s605_s20 = smov [#allocation9]  }
  0x25   :  { %s43_s19 = sshll.u32 %s604_s18, 4  ;;  %s55_s22 = sshll.u32 %s605_s20, 4  ;;  %s44_s19 = int_to_ptr.vmem [resolvable:$true] %s43_s19  ;;  %s678_s22 = int_to_ptr.vmem [resolvable:$true] %s55_s22 }
  0x26   :  { %s526_s25 = scalar_lea.hbm %s746_s2, 256 }
  0x27   :  { %p527_p2 = scmp.ne.s32.totalorder %s746_s2, %s526_s25  ;;  %p530_p3 = scmp.lt.u32.totalorder %s526_s25, %s746_s2 }
  0x29   :  { %p532_p4 = pnand %p530_p3, %p527_p2 }
  0x2b   :  { %535 = shalt.err (!%p532_p4)
}
  0x2c   :  { %s536_s0 = scalar_lea.vmem %s44_s19, 256  ;;  %p541_p6 = scmp.lt.s32.totalorder %s44_s19, %s44_s19 }
  0x2d   :  { %p537_p5 = scmp.ne.s32.totalorder %s44_s19, %s536_s0  ;;  %p542_p7 = scmp.lt.s32.totalorder %s536_s0, %s536_s0 }
  0x2f   :  { %p543_p8 = por %p542_p7, %p541_p6 }
  0x31   :  { %p544_p9 = pnand %p543_p8, %p537_p5 }
  0x33   :  { %547 = shalt.err (!%p544_p9)
}
  0x34   :  { %49 = dma.hbm_to_vmem [thread:$0]  %s746_s2, 256, %s44_s19, [#allocation7], %s602_s30, %s602_s30, %s603_s6  }
  0x35   :  { %s548_s10 = scalar_lea.hbm %s747_s3, 256 }
  0x36   :  { %p549_p10 = scmp.ne.s32.totalorder %s747_s3, %s548_s10  ;;  %p552_p11 = scmp.lt.u32.totalorder %s548_s10, %s747_s3 }
  0x38   :  { %p554_p12 = pnand %p552_p11, %p549_p10 }
  0x3a   :  { %557 = shalt.err (!%p554_p12)
}
  0x3b   :  { %s558_s15 = scalar_lea.vmem %s678_s22, 256  ;;  %p563_p0 = scmp.lt.s32.totalorder %s678_s22, %s678_s22 }
  0x3c   :  { %p559_p13 = scmp.ne.s32.totalorder %s678_s22, %s558_s15  ;;  %p564_p1 = scmp.lt.s32.totalorder %s558_s15, %s558_s15 }
  0x3e   :  { %p565_p2 = por %p564_p1, %p563_p0 }
  0x40   :  { %p566_p3 = pnand %p565_p2, %p559_p13 }
  0x42   :  { %569 = shalt.err (!%p566_p3)
}
  0x43   :  { %61 = dma.hbm_to_vmem [thread:$0]  %s747_s3, 256, %s678_s22, [#allocation10], %s602_s30, %s602_s30, %s603_s6  }
  0x44   :  { %592 = dma.done.wait [#allocation4], 256  }
  0x45   :  { %593 = vsyncadd [#allocation4], 4294967040 }
  0x46   :  { %594 = dma.done.wait [#allocation7], 512  }
  0x47   :  { %595 = vsyncadd [#allocation7], 4294966784 }
  0x48   :  { %596 = dma.done.wait [#allocation10], 256  }
  0x49   :  { %597 = vsyncadd [#allocation10], 4294967040  ;;  %v606_v0 = vmov 0.0|0.0   ;;  %vm607_vm0 = vmmov 0   ;;  %v608_v1 = vmov 0.0   ;;  %vm80_vm1 = vcmask 130048  }
  0x4a   :  { %454 = vmatprep.subr.bf16.mxu1 %v606_v0  ;;  %440 = vmatprep.mubr.msk.f32.mxu1 %vm607_vm0, %v608_v1  ;;  %vm167_vm2 = vcmask 195584   ;;  %v78_v2 = vld [vmem:[#allocation9] sm:$0xff]  ;;  %v79_v3 = vld [vmem:[#allocation9 + $0x8] sm:$0xff]  ;;  %v76_v4 = vld [vmem:[#allocation3] sm:$0xff]  ;;  %v609_v11 = vmov 32   ;;  %v259_v17 = vlaneseq }
  0x4b   :  { %v450_v5 = vpack.c.bf16 %v79_v3, %v78_v2  ;;  %433 = vmatprep.mubr.msk.f32.mxu0 %vm80_vm1, %v76_v4  ;;  %v165_v6 = vld [vmem:[#allocation6] sm:$0xff]  ;;  %v166_v7 = vld [vmem:[#allocation6 + $0x8] sm:$0xff]  ;;  %vm456_vm3 = vmpackc.low %vm167_vm2, %vm167_vm2  ;;  %473 = vset.pattern.permute.xlu0 %v609_v11 }
  0x4c   :  { %v455_v8 = vpack.c.bf16 %v166_v7, %v165_v6  ;;  %v77_v9 = vld [vmem:[#allocation3 + $0x8] sm:$0xff]  ;;  %v164_v10 = vld [vmem:[%s748_s4] sm:$0x1]  ;;  %v260_v18 = vshrl.u32 %v259_v17, 7  ;;  %s610_s4 = smov [#allocation11]  }
  0x4d   :  { %451 = vmatprep.subr.bf16.mxu0 %v450_v5  ;;  %v271_v24 = vld [vmem:[#allocation8] sm:$0xff]  ;;  %v272_v30 = vld [vmem:[#allocation8 + $0x8] sm:$0xff]  ;;  %s397_s17 = sshll.u32 %s610_s4, 4  ;;  %s398_s17 = int_to_ptr.vmem [resolvable:$true] %s397_s17 }
  0x4e   :  { %453 = vmatpush3.bf16.msra.mxu0 %v450_v5  ;;  %457 = vmatpush3.bf16.xpose.msk.msra.mxu1 %vm456_vm3, %v455_v8  ;;  %v261_v19 = vsub.s32 0, %v260_v18  ;;  %s570_s18 = scalar_lea.vmem %s398_s17, 256  ;;  %p575_p5 = scmp.lt.s32.totalorder %s398_s17, %s398_s17 }
  0x4f   :  { %p571_p4 = scmp.ne.s32.totalorder %s398_s17, %s570_s18  ;;  %p576_p6 = scmp.lt.s32.totalorder %s570_s18, %s570_s18 }
  0x51   :  { %434 = vmatmul.mubr.msk.f32.vlgmr.msra.gmra.mrb[0].mxu0 %vm80_vm1, %v77_v9  ;;  %p577_p7 = por %p576_p6, %p575_p5 }
  0x53   :  { %p578_p8 = pnand %p577_p7, %p571_p4 }
  0x55   :  { %441 = vmatmul.mubr.msk.f32.vlgmr.msra.gmra.mrb[0].mxu1 %vm167_vm2, %v164_v10 }
 0x124   :  { %v435_v12 = vpop.f32.mrb[0].mxu0 }
 0x125   :  { %v153_v13 = vpop.f32.mrb[1].mxu0 }
 0x126   :  { %v458_v14 = vpack.c.bf16 %v435_v12, %v153_v13  ;;  %251 = vperm.xlu0 %473, %v153_v13  }
 0x128   :  { %459 = vmatprep.subr.bf16.mxu0 %v458_v14  ;;  %v243_v15 = vpop.f32.mrb[0].mxu1 }
 0x129   :  { %461 = vmatpush3.bf16.msra.mxu0 %v458_v14  ;;  %v442_v16 = vpop.f32.mrb[1].mxu1  ;;  %v262_v20 = vrot.slane %v243_v15, %v261_v19 }
 0x12a   :  { %256 = vperm.xlu0 %473, %v435_v12  }
 0x1a5   :  { %v252_v21 = vpop.permute.xlu0 %251 }
 0x1a6   :  { %v263_v22 = vadd.f32 %v262_v20, %v252_v21 }
 0x1a8   :  { %v267_v23 = vmul.f32 0.2, %v263_v22  ;;  %vm265_vm4 = vcmp.gt.f32.partialorder %v263_v22, 0.0 }
 0x1a9   :  { %v257_v25 = vpop.permute.xlu0 %256 }
 0x1aa   :  { %v264_v26 = vadd.f32 %v262_v20, %v257_v25  ;;  %v269_v27 = vsel %vm265_vm4, %v263_v22, %v267_v23 }
 0x1ab   :  { %v273_v28 = vadd.f32 %v271_v24, %v269_v27 }
 0x1ac   :  { %vm266_vm5 = vcmp.gt.f32.partialorder %v264_v26, 0.0  ;;  %v268_v29 = vmul.f32 0.2, %v264_v26 }
 0x1ad   :  { %v275_v31 = vsel %vm80_vm1, %v273_v28, -inf }
 0x1ae   :  { %276 = vmax.xlane.f32.xlu1 %v275_v31  ;;  %v270_v32 = vsel %vm266_vm5, %v264_v26, %v268_v29 }
 0x1af   :  { %v274_v33 = vadd.f32 %v272_v30, %v270_v32 }
 0x1b1   :  { %v278_v34 = vsel %vm80_vm1, %v274_v33, -inf }
 0x1b2   :  { %279 = vmax.xlane.f32.xlu1 %v278_v34 }
 0x23b   :  { %v277_v35 = vpop.xlane.xlu1 %276 }
 0x23c   :  { %v281_v36 = vsub.f32 %v273_v28, %v277_v35 }
 0x23e   :  { %v283_v37 = vmul.f32 1.442695, %v281_v36 }
 0x23f   :  { %v280_v38 = vpop.xlane.xlu1 %279 }
 0x240   :  { %474 = vpow2.f32 %v283_v37  ;;  %v282_v39 = vsub.f32 %v274_v33, %v280_v38 }
 0x242   :  { %v285_v40 = vmul.f32 1.442695, %v282_v39 }
 0x244   :  { %476 = vpow2.f32 %v285_v40 }
 0x24a   :  { %v475_v41 = vpop.eup %474 }
 0x24b   :  { %v287_v42 = vsel %vm80_vm1, %v475_v41, 0.0 }
 0x24c   :  { %288 = vadd.xlane.f32.xlu0 %v287_v42 }
 0x24e   :  { %v477_v43 = vpop.eup %476 }
 0x24f   :  { %v290_v44 = vsel %vm80_vm1, %v477_v43, 0.0 }
 0x250   :  { %291 = vadd.xlane.f32.xlu1 %v290_v44 }
 0x2d9   :  { %v289_v45 = vpop.xlane.xlu0 %288 }
 0x2da   :  { %478 = vrcp.f32 %v289_v45 }
 0x2dd   :  { %v292_v46 = vpop.xlane.xlu1 %291 }
 0x2de   :  { %480 = vrcp.f32 %v292_v46 }
 0x2e4   :  { %v479_v47 = vpop.eup %478 }
 0x2e5   :  { %v295_v48 = vmul.f32 %v479_v47, %v289_v45 }
 0x2e7   :  { %v297_v49 = vsub.f32 2.0, %v295_v48 }
 0x2e8   :  { %v481_v50 = vpop.eup %480 }
 0x2e9   :  { %v299_v51 = vmul.f32 %v479_v47, %v297_v49  ;;  %v296_v52 = vmul.f32 %v481_v50, %v292_v46 }
 0x2eb   :  { %v301_v53 = vmul.f32 %v475_v41, %v299_v51  ;;  %v298_v54 = vsub.f32 2.0, %v296_v52 }
 0x2ed   :  { %v300_v55 = vmul.f32 %v481_v50, %v298_v54  ;;  %447 = vmatprep.mubr.msk.f32.mxu0 %vm80_vm1, %v301_v53 }
 0x2ef   :  { %v302_v56 = vmul.f32 %v477_v43, %v300_v55 }
 0x2f1   :  { %448 = vmatmul.mubr.msk.f32.vlgmr.msra.gmra.mrb[2].mxu0 %vm80_vm1, %v302_v56 }
 0x3c4   :  { %v449_v57 = vpop.f32.mrb[2].mxu0 }
 0x3c5   :  { %vm385_vm6 = vcmp.gt.f32.partialorder %v449_v57, 0.0  ;;  %v387_v58 = vmul.f32 0.01, %v449_v57  ;;  %v375_v59 = vpop.f32.mrb[3].mxu0 }
 0x3c6   :  { %vm384_vm7 = vcmp.gt.f32.partialorder %v375_v59, 0.0  ;;  %v386_v60 = vmul.f32 0.01, %v375_v59 }
 0x3c7   :  { %v389_v61 = vsel %vm385_vm6, %v449_v57, %v387_v58 }
 0x3c8   :  { %391 = vst [vmem:[#allocation11 + $0x8] sm:$0xff] %v389_v61  ;;  %v388_v62 = vsel %vm384_vm7, %v375_v59, %v386_v60 }
 0x3c9   :  { %390 = vst [vmem:[#allocation11] sm:$0xff] %v388_v62 }
 0x3ca   :  { %581 = shalt.err (!%p578_p8)
}
 0x3cb   :  { %s582_s22 = scalar_lea.hbm %s749_s5, 256 }
 0x3cc   :  { %p583_p9 = scmp.ne.s32.totalorder %s749_s5, %s582_s22  ;;  %p586_p10 = scmp.lt.u32.totalorder %s582_s22, %s749_s5 }
 0x3ce   :  { %p588_p11 = pnand %p586_p10, %p583_p9 }
 0x3d0   :  { %591 = shalt.err (!%p588_p11)
}
 0x3d1   :  { %403 = dma.vmem_to_hbm [thread:$0]  %s398_s17, 256, %s749_s5, [#allocation5], %s602_s30, %s602_s30, %s603_s6  }
 0x3d2   :  { %598 = dma.done.wait [#allocation5], 256  }
 0x3d3   :  { %599 = vsyncadd [#allocation5], 4294967040 }
 0x3d4   :  { %407 = vsyncpa [#allocation4], 1 }
 0x3d5   :  { %408 = vsyncpa [#allocation7], 1 }
 0x3d6   :  { %409 = vsyncpa [#allocation10], 1 }
 0x3d7   :  { %410 = vsyncpa [#allocation5], 1 }

</bundles_post_ra>
